<compile_context>
chip_gen: v7x
topology: tpu7x:2x2x1
jax: 0.10.0
libtpu: 0.0.40
codegen_flags: <defaults>
</compile_context>

<pallas_src>
import functools

import jax
import jax.numpy as jnp
from jax import lax
from jax.experimental import pallas as pl
from jax.experimental.pallas import tpu as pltpu


def _mhsa_kernel(x_ref, wq_ref, wk_ref, wv_ref, wo_ref, o_ref, acc_ref,
                 *, q_tile, scale):
    """One (batch, query-tile, head) step.

    x_ref  : (1, N, D)   token slab (resident across qt/h; re-DMAed per batch)
    wq/wk/wv_ref : (1, D, hd)  per-head projection weights
    wo_ref : (1, hd, D)  per-head rows of the output projection
    o_ref  : (1, TQ, D)  output query tile (written once, at the last head)
    acc_ref: (TQ, D) f32 scratch accumulating sum_h softmax(QK^T)V_h @ Wo_h
    """
    qt = pl.program_id(1)
    h = pl.program_id(2)

    x = x_ref[0]                                     # (N, D)  keys/values rows
    wq = wq_ref[0]                                   # (D, hd)
    wk = wk_ref[0]
    wv = wv_ref[0]
    wo = wo_ref[0]                                   # (hd, D)

    q_start = pl.multiple_of(qt * q_tile, q_tile)
    xq = x_ref[0, pl.ds(q_start, q_tile), :]         # (TQ, D) query rows

    compute_dtype = x.dtype

    # Projections (MXU), f32 accumulation; 1/sqrt(hd) folded into q.
    q = jnp.dot(xq, wq, preferred_element_type=jnp.float32) * scale   # (TQ, hd)
    k = jnp.dot(x, wk, preferred_element_type=jnp.float32)            # (N, hd)
    v = jnp.dot(x, wv, preferred_element_type=jnp.float32)            # (N, hd)

    # Scores: contract head_dim of q and k directly (no transposed copy of k).
    s = lax.dot_general(q.astype(compute_dtype), k.astype(compute_dtype),
                        (((1,), (1,)), ((), ())),
                        preferred_element_type=jnp.float32)            # (TQ, N)

    # Numerically-stable softmax; normalization deferred past the PV matmul.
    m = jnp.max(s, axis=-1, keepdims=True)
    p = jnp.exp(s - m)
    l = jnp.sum(p, axis=-1, keepdims=True)

    o_h = jnp.dot(p.astype(compute_dtype), v.astype(compute_dtype),
                  preferred_element_type=jnp.float32)                  # (TQ, hd)
    o_h = o_h * pl.reciprocal(l)                                       # O(TQ) recip

    # Per-head contribution through the matching rows of W_o (no concat).
    contrib = jnp.dot(o_h.astype(compute_dtype), wo,
                      preferred_element_type=jnp.float32)              # (TQ, D)

    @pl.when(h == 0)
    def _init():
        acc_ref[...] = jnp.zeros_like(acc_ref)

    acc_ref[...] += contrib

    @pl.when(h == pl.num_programs(2) - 1)
    def _flush():
        o_ref[0] = acc_ref[...].astype(o_ref.dtype)


def _pick_q_tile(n):
    """Query rows per grid step: full N for short sequences, else a 128-multiple
    so the on-chip score tile is (TQ, N) rather than (N, N)."""
    if n <= 512:
        return n
    for t in (512, 256, 128):
        if n % t == 0:
            return t
    return n  # awkward N: one tile  # TODO(synk): pad/mask ragged sequence lengths


def multi_head_self_attention(x, w_q, w_k, w_v, w_o, *, num_heads):
    """x: (B, N, D); w_*: (D, D) stored as (in, out) = torch weight.T."""
    B, N, D = x.shape
    assert D % num_heads == 0, "embed_dim must be divisible by num_heads"
    hd = D // num_heads
    q_tile = _pick_q_tile(N)
    n_q_tiles = N // q_tile
    scale = 1.0 / (hd ** 0.5)

    # Per-head weight layout (host-side, once):
    #   wq/wk/wv[h] = W[:, h*hd:(h+1)*hd]   -> (H, D, hd)
    #   wo[h]       = Wo[h*hd:(h+1)*hd, :]  -> (H, hd, D)
    def per_head_cols(w):
        return w.reshape(D, num_heads, hd).transpose(1, 0, 2)

    wq_h = per_head_cols(w_q)
    wk_h = per_head_cols(w_k)
    wv_h = per_head_cols(w_v)
    wo_h = w_o.reshape(num_heads, hd, D)

    kernel = functools.partial(_mhsa_kernel, q_tile=q_tile, scale=scale)

    x_spec = pl.BlockSpec((1, N, D), lambda b, qt, h: (b, 0, 0))
    wqkv_spec = pl.BlockSpec((1, D, hd), lambda b, qt, h: (h, 0, 0))
    wo_spec = pl.BlockSpec((1, hd, D), lambda b, qt, h: (h, 0, 0))
    out_spec = pl.BlockSpec((1, q_tile, D), lambda b, qt, h: (b, qt, 0))

    itemsize = x.dtype.itemsize
    vmem_est = (
        2 * N * D * itemsize                       # x slab (double-buffered)
        + 2 * 4 * D * hd * itemsize                # per-head weights (x2 bufs)
        + 2 * q_tile * D * itemsize                # output tile (x2 bufs)
        + q_tile * D * 4                           # f32 accumulator scratch
        + (q_tile * hd + 2 * N * hd + 2 * q_tile * N + q_tile * D) * 4  # temps
    )
    vmem_limit = int(min(max(2 * vmem_est, 32 * 1024 * 1024), 64 * 1024 * 1024))

    cost = pl.CostEstimate(
        flops=int(B * (8 * N * D * D + 4 * N * N * D)),
        transcendentals=int(B * num_heads * N * N),
        bytes_accessed=int((2 * B * N * D + 4 * D * D) * itemsize),
    )

    return pl.pallas_call(
        kernel,
        out_shape=jax.ShapeDtypeStruct((B, N, D), x.dtype),
        grid_spec=pltpu.PrefetchScalarGridSpec(
            num_scalar_prefetch=0,
            grid=(B, n_q_tiles, num_heads),
            in_specs=[x_spec, wqkv_spec, wqkv_spec, wqkv_spec, wo_spec],
            out_specs=out_spec,
            scratch_shapes=[pltpu.VMEM((q_tile, D), jnp.float32)],
        ),
        compiler_params=pltpu.CompilerParams(
            dimension_semantics=("parallel", "parallel", "arbitrary"),
            vmem_limit_bytes=vmem_limit,
        ),
        cost_estimate=cost,
    )(x, wq_h, wk_h, wv_h, wo_h)


def _reference(x, w_q, w_k, w_v, w_o, *, num_heads):
    """Pure-JAX reference mirroring the PyTorch forward."""
    B, N, D = x.shape
    hd = D // num_heads

    def split(y):  # (B, N, D) -> (B, H, N, hd)
        return y.reshape(B, N, num_heads, hd).transpose(0, 2, 1, 3)

    Q = split(x @ w_q)
    K = split(x @ w_k)
    V = split(x @ w_v)
    s = jnp.einsum("bhqd,bhkd->bhqk", Q, K) / (hd ** 0.5)
    p = jax.nn.softmax(s, axis=-1)
    o = jnp.einsum("bhqk,bhkd->bhqd", p, V)
    o = o.transpose(0, 2, 1, 3).reshape(B, N, D)
    return o @ w_o


def _run_case(key, B, N, D, num_heads, atol):
    kx, kq, kk, kv, ko = jax.random.split(key, 5)
    x = jax.random.normal(kx, (B, N, D), dtype=jnp.float32)
    scale = 1.0 / (D ** 0.5)
    w_q = jax.random.normal(kq, (D, D), dtype=jnp.float32) * scale
    w_k = jax.random.normal(kk, (D, D), dtype=jnp.float32) * scale
    w_v = jax.random.normal(kv, (D, D), dtype=jnp.float32) * scale
    w_o = jax.random.normal(ko, (D, D), dtype=jnp.float32) * scale

    out = multi_head_self_attention(x, w_q, w_k, w_v, w_o, num_heads=num_heads)
    out = jax.block_until_ready(out)
    ref = _reference(x, w_q, w_k, w_v, w_o, num_heads=num_heads)
    assert out.shape == (B, N, D)
    assert jnp.allclose(out, ref, atol=atol, rtol=atol), "mismatch vs reference"


if __name__ == "__main__":
    key = jax.random.PRNGKey(0)
    k1, k2 = jax.random.split(key, 2)

    # Small shape consistent with the module: batch=2, seq=8, embed=32, heads=4.
    _run_case(k1, B=2, N=8, D=32, num_heads=4, atol=2e-4)

    # Longer sequence to exercise the query-tile grid axis (TQ < N).
    _run_case(k2, B=1, N=1024, D=64, num_heads=2, atol=2e-4)

    print("KERNEL_OK")
</pallas_src>

<mosaic_0001>
module attributes {stable_mosaic.version = 11 : i64} {
  func.func @_mhsa_kernel(%arg0: i32, %arg1: i32, %arg2: i32, %arg3: memref<1x8x32xf32, #tpu.memory_space<vmem>>, %arg4: memref<1x32x8xf32, #tpu.memory_space<vmem>>, %arg5: memref<1x32x8xf32, #tpu.memory_space<vmem>>, %arg6: memref<1x32x8xf32, #tpu.memory_space<vmem>>, %arg7: memref<1x8x32xf32, #tpu.memory_space<vmem>>, %arg8: memref<1x8x32xf32, #tpu.memory_space<vmem>>, %arg9: memref<8x32xf32, #tpu.memory_space<vmem>>) attributes {dimension_semantics = [#tpu.dimension_semantics<parallel>, #tpu.dimension_semantics<parallel>, #tpu.dimension_semantics<arbitrary>], iteration_bounds = array<i64: 2, 1, 4>, scalar_prefetch = 0 : i64, scratch_operands = 1 : i64, tpu.core_type = #tpu.core_type<tc>, window_params = [{transform_indices = @transform_0, window_bounds = array<i64: 1, 8, 32>}, {transform_indices = @transform_1, window_bounds = array<i64: 1, 32, 8>}, {transform_indices = @transform_2, window_bounds = array<i64: 1, 32, 8>}, {transform_indices = @transform_3, window_bounds = array<i64: 1, 32, 8>}, {transform_indices = @transform_4, window_bounds = array<i64: 1, 8, 32>}, {transform_indices = @transform_5, window_bounds = array<i64: 1, 8, 32>}]} {
    %c0 = arith.constant 0 : index
    %c0_0 = arith.constant 0 : index
    %c0_1 = arith.constant 0 : index
    %0 = vector.load %arg3[%c0, %c0_0, %c0_1] : memref<1x8x32xf32, #tpu.memory_space<vmem>>, vector<1x8x32xf32>
    %1 = vector.shape_cast %0 : vector<1x8x32xf32> to vector<8x32xf32>
    %c0_2 = arith.constant 0 : index
    %c0_3 = arith.constant 0 : index
    %c0_4 = arith.constant 0 : index
    %2 = vector.load %arg4[%c0_2, %c0_3, %c0_4] : memref<1x32x8xf32, #tpu.memory_space<vmem>>, vector<1x32x8xf32>
    %3 = vector.shape_cast %2 : vector<1x32x8xf32> to vector<32x8xf32>
    %c0_5 = arith.constant 0 : index
    %c0_6 = arith.constant 0 : index
    %c0_7 = arith.constant 0 : index
    %4 = vector.load %arg5[%c0_5, %c0_6, %c0_7] : memref<1x32x8xf32, #tpu.memory_space<vmem>>, vector<1x32x8xf32>
    %5 = vector.shape_cast %4 : vector<1x32x8xf32> to vector<32x8xf32>
    %c0_8 = arith.constant 0 : index
    %c0_9 = arith.constant 0 : index
    %c0_10 = arith.constant 0 : index
    %6 = vector.load %arg6[%c0_8, %c0_9, %c0_10] : memref<1x32x8xf32, #tpu.memory_space<vmem>>, vector<1x32x8xf32>
    %7 = vector.shape_cast %6 : vector<1x32x8xf32> to vector<32x8xf32>
    %c0_11 = arith.constant 0 : index
    %c0_12 = arith.constant 0 : index
    %c0_13 = arith.constant 0 : index
    %8 = vector.load %arg7[%c0_11, %c0_12, %c0_13] : memref<1x8x32xf32, #tpu.memory_space<vmem>>, vector<1x8x32xf32>
    %9 = vector.shape_cast %8 : vector<1x8x32xf32> to vector<8x32xf32>
    %c8_i32 = arith.constant 8 : i32
    %10 = arith.muli %arg1, %c8_i32 : i32
    %11 = tpu.assume_multiple %10, 8 : i32
    %c0_14 = arith.constant 0 : index
    %12 = arith.index_cast %11 : i32 to index
    %c0_15 = arith.constant 0 : index
    %13 = vector.load %arg3[%c0_14, %12, %c0_15] : memref<1x8x32xf32, #tpu.memory_space<vmem>>, vector<1x8x32xf32>
    %14 = vector.shape_cast %13 : vector<1x8x32xf32> to vector<8x32xf32>
    %cst = arith.constant dense<0.000000e+00> : vector<8x8xf32>
    %15 = tpu.matmul %14, %3, %cst {dimension_numbers = #tpu.dot_dimension_numbers<[1], [0], [0], [1], [0, 0, 1, 1], [], []>} : vector<8x32xf32>, vector<32x8xf32>, vector<8x8xf32> -> vector<8x8xf32>
    %cst_16 = arith.constant 0.353553385 : f32
    %16 = vector.broadcast %cst_16 : f32 to vector<8x8xf32>
    %17 = arith.mulf %15, %16 : vector<8x8xf32>
    %cst_17 = arith.constant dense<0.000000e+00> : vector<8x8xf32>
    %18 = tpu.matmul %1, %5, %cst_17 {dimension_numbers = #tpu.dot_dimension_numbers<[1], [0], [0], [1], [0, 0, 1, 1], [], []>} : vector<8x32xf32>, vector<32x8xf32>, vector<8x8xf32> -> vector<8x8xf32>
    %cst_18 = arith.constant dense<0.000000e+00> : vector<8x8xf32>
    %19 = tpu.matmul %1, %7, %cst_18 {dimension_numbers = #tpu.dot_dimension_numbers<[1], [0], [0], [1], [0, 0, 1, 1], [], []>} : vector<8x32xf32>, vector<32x8xf32>, vector<8x8xf32> -> vector<8x8xf32>
    %cst_19 = arith.constant dense<0.000000e+00> : vector<8x8xf32>
    %20 = tpu.matmul %17, %18, %cst_19 {dimension_numbers = #tpu.dot_dimension_numbers<[1], [1], [0], [0], [0, 0, 1, 0], [], []>} : vector<8x8xf32>, vector<8x8xf32>, vector<8x8xf32> -> vector<8x8xf32>
    %cst_20 = arith.constant dense<0xFF800000> : vector<8xf32>
    %21 = vector.multi_reduction <maximumf>, %20, %cst_20 [1] : vector<8x8xf32> to vector<8xf32>
    %22 = vector.shape_cast %21 : vector<8xf32> to vector<8x1xf32>
    %23 = vector.broadcast %22 : vector<8x1xf32> to vector<8x8xf32>
    %24 = arith.subf %20, %23 : vector<8x8xf32>
    %25 = math.exp %24 : vector<8x8xf32>
    %cst_21 = arith.constant dense<0.000000e+00> : vector<8xf32>
    %26 = vector.multi_reduction <add>, %25, %cst_21 [1] : vector<8x8xf32> to vector<8xf32>
    %27 = vector.shape_cast %26 : vector<8xf32> to vector<8x1xf32>
    %cst_22 = arith.constant dense<0.000000e+00> : vector<8x8xf32>
    %28 = tpu.matmul %25, %19, %cst_22 {dimension_numbers = #tpu.dot_dimension_numbers<[1], [0], [0], [1], [0, 0, 1, 1], [], []>} : vector<8x8xf32>, vector<8x8xf32>, vector<8x8xf32> -> vector<8x8xf32>
    %29 = tpu.reciprocal %27 : vector<8x1xf32> -> vector<8x1xf32>
    %30 = vector.broadcast %29 : vector<8x1xf32> to vector<8x8xf32>
    %31 = arith.mulf %28, %30 : vector<8x8xf32>
    %cst_23 = arith.constant dense<0.000000e+00> : vector<8x32xf32>
    %32 = tpu.matmul %31, %9, %cst_23 {dimension_numbers = #tpu.dot_dimension_numbers<[1], [0], [0], [1], [0, 0, 1, 1], [], []>} : vector<8x8xf32>, vector<8x32xf32>, vector<8x32xf32> -> vector<8x32xf32>
    %c0_i32 = arith.constant 0 : i32
    %33 = arith.cmpi eq, %arg2, %c0_i32 : i32
    %34 = arith.extui %33 : i1 to i32
    %c0_i32_24 = arith.constant 0 : i32
    %35 = arith.cmpi ne, %34, %c0_i32_24 : i32
    scf.if %35 {
      %cst_30 = arith.constant 0.000000e+00 : f32
      %42 = vector.broadcast %cst_30 : f32 to vector<8x32xf32>
      %c0_31 = arith.constant 0 : index
      %c0_32 = arith.constant 0 : index
      %43 = vector.load %arg9[%c0_31, %c0_32] : memref<8x32xf32, #tpu.memory_space<vmem>>, vector<8x32xf32>
      tpu.vector_store %arg9[%c0_31, %c0_32], %42 {strides = array<i32>} : memref<8x32xf32, #tpu.memory_space<vmem>>, vector<8x32xf32>,
    } else {
    }
    %c0_25 = arith.constant 0 : index
    %c0_26 = arith.constant 0 : index
    %36 = vector.load %arg9[%c0_25, %c0_26] : memref<8x32xf32, #tpu.memory_space<vmem>>, vector<8x32xf32>
    %37 = arith.addf %36, %32 : vector<8x32xf32>
    %c0_27 = arith.constant 0 : index
    %c0_28 = arith.constant 0 : index
    %38 = vector.load %arg9[%c0_27, %c0_28] : memref<8x32xf32, #tpu.memory_space<vmem>>, vector<8x32xf32>
    tpu.vector_store %arg9[%c0_27, %c0_28], %37 {strides = array<i32>} : memref<8x32xf32, #tpu.memory_space<vmem>>, vector<8x32xf32>,
    %c3_i32 = arith.constant 3 : i32
    %39 = arith.cmpi eq, %arg2, %c3_i32 : i32
    %40 = arith.extui %39 : i1 to i32
    %c0_i32_29 = arith.constant 0 : i32
    %41 = arith.cmpi ne, %40, %c0_i32_29 : i32
    scf.if %41 {
      %c0_30 = arith.constant 0 : index
      %c0_31 = arith.constant 0 : index
      %42 = vector.load %arg9[%c0_30, %c0_31] : memref<8x32xf32, #tpu.memory_space<vmem>>, vector<8x32xf32>
      %c0_32 = arith.constant 0 : index
      %c0_33 = arith.constant 0 : index
      %c0_34 = arith.constant 0 : index
      %43 = vector.load %arg8[%c0_32, %c0_33, %c0_34] : memref<1x8x32xf32, #tpu.memory_space<vmem>>, vector<1x8x32xf32>
      %44 = vector.shape_cast %43 : vector<1x8x32xf32> to vector<8x32xf32>
      %45 = vector.shape_cast %42 : vector<8x32xf32> to vector<1x8x32xf32>
      tpu.vector_store %arg8[%c0_32, %c0_33, %c0_34], %45 {strides = array<i32>} : memref<1x8x32xf32, #tpu.memory_space<vmem>>, vector<1x8x32xf32>,
    } else {
    }
    return
  }
  func.func @transform_0(%arg0: i32, %arg1: i32, %arg2: i32) -> (i32, i32, i32) {
    %c0_i32 = arith.constant 0 : i32
    %c0_i32_0 = arith.constant 0 : i32
    %c0_i32_1 = arith.constant 0 : i32
    return %arg0, %c0_i32, %c0_i32_0 : i32, i32, i32
  }
  func.func @transform_1(%arg0: i32, %arg1: i32, %arg2: i32) -> (i32, i32, i32) {
    %c0_i32 = arith.constant 0 : i32
    %c0_i32_0 = arith.constant 0 : i32
    %c0_i32_1 = arith.constant 0 : i32
    return %arg2, %c0_i32, %c0_i32_0 : i32, i32, i32
  }
  func.func @transform_2(%arg0: i32, %arg1: i32, %arg2: i32) -> (i32, i32, i32) {
    %c0_i32 = arith.constant 0 : i32
    %c0_i32_0 = arith.constant 0 : i32
    %c0_i32_1 = arith.constant 0 : i32
    return %arg2, %c0_i32, %c0_i32_0 : i32, i32, i32
  }
  func.func @transform_3(%arg0: i32, %arg1: i32, %arg2: i32) -> (i32, i32, i32) {
    %c0_i32 = arith.constant 0 : i32
    %c0_i32_0 = arith.constant 0 : i32
    %c0_i32_1 = arith.constant 0 : i32
    return %arg2, %c0_i32, %c0_i32_0 : i32, i32, i32
  }
  func.func @transform_4(%arg0: i32, %arg1: i32, %arg2: i32) -> (i32, i32, i32) {
    %c0_i32 = arith.constant 0 : i32
    %c0_i32_0 = arith.constant 0 : i32
    %c0_i32_1 = arith.constant 0 : i32
    return %arg2, %c0_i32, %c0_i32_0 : i32, i32, i32
  }
  func.func @transform_5(%arg0: i32, %arg1: i32, %arg2: i32) -> (i32, i32, i32) {
    %c0_i32 = arith.constant 0 : i32
    %c0_i32_0 = arith.constant 0 : i32
    return %arg0, %arg1, %c0_i32 : i32, i32, i32
  }
}

</mosaic_0001>

<bundles_post_ra>
// kernel: tpu_custom_call.1
= control target key start
LH: loop header
LB: loop body
LE: loop exit
PB: predicated region body
PF: predicated region fallthrough
CT: control target
= control target key end

     0   :  { %10 = vsyncpa [#allocation4], 0  ;;  %s1443_s0 = inlined_call_operand.vmem [shape: f32[2,8,32], index: 0, kind: input, shape index: {}]   ;;  %s1444_s1 = inlined_call_operand.vmem [shape: f32[4,32,8], index: 1, kind: input, shape index: {}]   ;;  %s1445_s2 = inlined_call_operand.vmem [shape: f32[4,32,8], index: 2, kind: input, shape index: {}]   ;;  %s1446_s3 = inlined_call_operand.vmem [shape: f32[4,32,8], index: 3, kind: input, shape index: {}]   ;;  %s1447_s4 = inlined_call_operand.vmem [shape: f32[4,8,32], index: 4, kind: input, shape index: {}]   ;;  %s1448_s5 = inlined_call_operand.hbm [shape: f32[2,8,32], index: 5, kind: output, shape index: {}]  }
   0x1   :  { %12 = vsyncpa [#allocation4 + $0x1], 0  ;;  %s1267_s18 = smov 0   ;;  %s1269_s19 = smov 0  }
   0x2   :  { %s1271_s20 = smov 0   ;;  %s1273_s21 = smov 0  }
   0x3   :  { %s1275_s22 = smov 0   ;;  %s1277_s23 = smov 0  }
   0x4   :  { %s1279_s24 = smov 0   ;;  %s1281_s25 = smov 0  }
   0x5 LB: > { %s940_s26 = sadd.s32 4294967295, %s1230_s25   ;;  %s941_s27 = sadd.s32 4294967294, %s1230_s25   ;;  %s1230_s25 = sphi %s1281_s25, %s18_s25   ;;  %s1226_s24 = sphi %s1279_s24, %s1457_s24   ;;  %s1222_s23 = sphi %s1277_s23, %s1456_s23   ;;  %s1218_s22 = sphi %s1275_s22, %s1455_s22   ;;  %s1214_s21 = sphi %s1273_s21, %s1454_s21   ;;  %s1210_s20 = sphi %s1271_s20, %s1453_s20   ;;  %s1206_s19 = sphi %s1269_s19, %s1452_s19   ;;  %s1202_s18 = sphi %s1267_s18, %s1451_s18  }
   0x6   : > { %s30_s28 = sadd.s32 1, %s1222_s23  ;;  %s37_s29 = sadd.s32 1, %s1226_s24 }
   0x7   : > { %p31_p0 = scmp.ge.s32.totalorder %s30_s28, 4  ;;  %p186_p1 = scmp.ne.s32.totalorder %s1210_s20, %s1206_s19 }
   0x8   : > { %p187_p2 = scmp.eq.s32.totalorder %s940_s26, 7  ;;  %p192_p4 = scmp.ne.s32.totalorder %s1206_s19, %s1202_s18 }
   0x9   : > { %s1459_s28 = smov (%p31_p0, %s30_s28), 0  ;;  %s1461_s29 = smov (!%p31_p0, %s37_s29), %s1226_s24 }
   0xa   : > { %p1316_p3 = por %p187_p2, %p186_p1  ;;  %p39_p5 = scmp.ge.s32.totalorder %s1461_s29, 2 }
   0xb   : > { %p193_p6 = scmp.eq.s32.totalorder %s941_s27, 7  ;;  %p944_p7 = scmp.ge.s32.totalorder %s1230_s25, 1 }
   0xc   : > { %p249_p8 = scmp.lt.s32.totalorder %s1230_s25, 9  ;;  %s1463_s29 = smov (%p39_p5, %s1461_s29), 0 }
   0xd   : > { %p1326_p9 = por %p193_p6, %p192_p4  ;;  %s171_s7 = ssub.s32 %s1226_s24, %s1463_s29 }
   0xe   : > { %p250_p10 = pnand %p944_p7, %p249_p8  ;;  %s176_s8 = sadd.s32 1, %s1210_s20 }
   0xf   : > { %p174_p11 = scmp.eq.s32.totalorder %s171_s7, 0  ;;  %s292_s10 = sand.u32 (!%p250_p10), 1, %s1206_s19   ;;  %v1232_v0 = vmov (!%p250_p10), 0.0|0.0   ;;  %vm1233_vm0 = vmmov (!%p250_p10), 0   ;;  %v1234_v1 = vmov (!%p250_p10), 0.0   ;;  %vm335_vm1 = vcmask (!%p250_p10), 261120  }
  0x10   : > { %253 = sbr.rel (%p250_p10) target bundleno = 1085 (0x43d), region = 40  ;;  %p299_p12 = scmp.lt.s32.totalorder (!%p250_p10), %s1214_s21, 3  ;;  %1045 = vmatprep.subr.bf16.mxu1 (!%p250_p10), %v1232_v0  ;;  %1039 = vmatprep.subr.bf16.mxu0 (!%p250_p10), %v1232_v0  ;;  %vm553_vm2 = vcmask (!%p250_p10), 64512  }
  0x11   : > { %s1334_s9 = scalar_select %p174_p11, %s1210_s20, %s176_s8  }
  0x12   : > { %s1340_s11 = sshll.u32 (!%p250_p10), %s292_s10, 3  ;;  %p295_p13 = scmp.lt.s32.totalorder (!%p250_p10), %s1218_s22, 1  ;;  %1010 = vmatprep.mubr.msk.f32.mxu1 (!%p250_p10), %vm1233_vm0, %v1234_v1  ;;  %999 = vmatprep.mubr.msk.f32.mxu0 (!%p250_p10), %vm1233_vm0, %v1234_v1 }
  0x13   : > { %s294_s16 = scalar_lea.vmem (!%p250_p10), [#allocation3], %s1340_s11  ;;  %p961_p0 = scmp.ne.s32.totalorder (!%p250_p10), %s1214_s21, 0 }
  0x17   : > { %s1346_s12 = scalar_select %p299_p12, %s1214_s21, 3 }
  0x18   : > { %s296_s13 = scalar_select %p295_p13, %s1218_s22, 1 }
  0x19   : > { %s1350_s14 = sshll.u32 %s1346_s12, 5  ;;  %v1235_v44 = vmov (!%p961_p0), 0.0  }
  0x1a   : > { %s308_s17 = scalar_lea.vmem %s1445_s2, %s1350_s14  ;;  %s303_s7 = scalar_lea.vmem %s1444_s1, %s1350_s14  ;;  %791 = vst.msk [vmem:[#allocation2] sm:$0xff] (!%p961_p0), %vm335_vm1, %v1235_v44 }
  0x1b   : > { %v323_v2 = vld [vmem:[%s308_s17] sm:$0xff]  ;;  %v324_v3 = vld [vmem:[%s308_s17 + $0x8] sm:$0xff]  ;;  %v325_v4 = vld [vmem:[%s308_s17 + $0x10] sm:$0xff]  ;;  %s946_s8 = sshll.u32 %s296_s13, 3  ;;  %s313_s27 = scalar_lea.vmem %s1446_s3, %s1350_s14 }
  0x1c   : > { %v1046_v5 = vpack.c.bf16 %v324_v3, %v323_v2  ;;  %v319_v6 = vld [vmem:[%s303_s7] sm:$0xff]  ;;  %v320_v7 = vld [vmem:[%s303_s7 + $0x8] sm:$0xff]  ;;  %v326_v8 = vld [vmem:[%s308_s17 + $0x18] sm:$0xff]  ;;  %s298_s26 = scalar_lea.vmem %s1443_s0, %s946_s8  ;;  %s953_s14 = sshll.u32 %s1346_s12, 3 }
  0x1d   : > { %v1040_v9 = vpack.c.bf16 %v320_v7, %v319_v6  ;;  %v321_v10 = vld [vmem:[%s303_s7 + $0x10] sm:$0xff]  ;;  %v322_v11 = vld [vmem:[%s303_s7 + $0x18] sm:$0xff]  ;;  %v1049_v12 = vpack.c.bf16 %v326_v8, %v325_v4  ;;  %v318_v14 = vld [vmem:[%s298_s26] sm:$0xff]  ;;  %s317_s15 = scalar_lea.vmem %s1447_s4, %s953_s14 }
  0x1e   : > { %1047 = vmatpush3.bf16.msra.mxu1 %v1046_v5  ;;  %v1043_v13 = vpack.c.bf16 %v322_v11, %v321_v10  ;;  %v327_v15 = vld [vmem:[%s313_s27] sm:$0xff]  ;;  %v328_v16 = vld [vmem:[%s313_s27 + $0x8] sm:$0xff]  ;;  %v329_v17 = vld [vmem:[%s313_s27 + $0x10] sm:$0xff] }
  0x1f   : > { %1041 = vmatpush3.bf16.msra.mxu0 %v1040_v9  ;;  %1048 = vmatprep.subr.bf16.mxu1 %v1232_v0  ;;  %v1052_v18 = vpack.c.bf16 %v328_v16, %v327_v15  ;;  %v330_v19 = vld [vmem:[%s313_s27 + $0x18] sm:$0xff]  ;;  %v331_v36 = vld [vmem:[%s317_s15] sm:$0xff] }
  0x20   : > { %1042 = vmatprep.subr.bf16.mxu0 %v1232_v0  ;;  %v1055_v20 = vpack.c.bf16 %v330_v19, %v329_v17 }
  0x22   : > { %1050 = vmatpush3.bf16.msra.mxu1 %v1049_v12 }
  0x23   : > { %1044 = vmatpush3.bf16.msra.mxu0 %v1043_v13  ;;  %1024 = vmatprep.subr.mxu1 %v1234_v1 }
  0x24   : > { %1051 = vmatprep.subr.bf16.mxu0 %v1232_v0 }
  0x25   : > { %1011 = vmatmul.mubr.msk.f32.vlgmr.msra.gmra.mrb[0].mxu1 %vm335_vm1, %v318_v14 }
  0x26   : > { %1000 = vmatmul.mubr.msk.f32.vlgmr.msra.gmra.mrb[0].mxu0 %vm335_vm1, %v318_v14  ;;  %1026 = vmatprep.mubr.msk.f32.mxu1 %vm1233_vm0, %v1234_v1 }
  0x27   : > { %1021 = vmatprep.mubr.msk.f32.mxu0 %vm1233_vm0, %v1234_v1  ;;  %1053 = vmatpush3.bf16.msra.mxu0 %v1052_v18 }
  0x28   : > { %1054 = vmatprep.subr.bf16.mxu0 %v1232_v0 }
  0x2b   : > { %1056 = vmatpush3.bf16.msra.mxu0 %v1055_v20 }
  0x2c   : > { %1034 = vmatprep.subr.mxu0 %v1234_v1 }
  0x2e   : > { %1022 = vmatmul.mubr.msk.f32.vlgmr.msra.gmra.mrb[2].mxu0 %vm335_vm1, %v318_v14 }
  0x2f   : > { %1036 = vmatprep.mubr.msk.f32.mxu0 %vm1233_vm0, %v1234_v1  ;;  %1035 = vmatpush3.msra.mxu0 %v331_v36 }
  0xf8   : > { %v479_v21 = vpop.f32.mrb[0].mxu1 }
  0xf9   : > { %v405_v22 = vpop.f32.mrb[0].mxu0  ;;  %v1012_v23 = vpop.f32.mrb[1].mxu1  ;;  %1025 = vmatpush3.xpose.msk.msra.mxu1 %vm553_vm2, %v479_v21 }
  0xfa   : > { %v409_v24 = vmul.f32 0.35355338, %v405_v22  ;;  %v1001_v25 = vpop.f32.mrb[1].mxu0  ;;  %1029 = vmatprep.subr.mxu1 %v1234_v1 }
  0xfc   : > { %1027 = vmatmul.mubr.msk.f32.vlgmr.msra.gmra.mrb[2].mxu1 %vm553_vm2, %v409_v24 }
  0xfd   : > { %1031 = vmatprep.mubr.msk.f32.mxu1 %vm1233_vm0, %v1234_v1 }
 0x101   : > { %v549_v29 = vpop.f32.mrb[2].mxu0 }
 0x102   : > { %v1023_v30 = vpop.f32.mrb[3].mxu0  ;;  %1030 = vmatpush3.msra.mxu1 %v549_v29 }
 0x1cf   : > { %v626_v26 = vpop.f32.mrb[2].mxu1 }
 0x1d0   : > { %v1028_v27 = vpop.f32.mrb[3].mxu1  ;;  %v630_v28 = vsel %vm553_vm2, %v626_v26, -inf }
 0x1d1   : > { %631 = vmax.xlane.f32.xlu0 %v630_v28 }
 0x25e   : > { %v632_v31 = vpop.xlane.xlu0 %631 }
 0x25f   : > { %v633_v32 = vsub.f32 %v626_v26, %v632_v31 }
 0x261   : > { %v634_v33 = vmul.f32 1.442695, %v633_v32 }
 0x263   : > { %1132 = vpow2.f32 %v634_v33 }
 0x26d   : > { %v1133_v34 = vpop.eup %1132 }
 0x26e   : > { %1032 = vmatmul.mubr.msk.f32.vlgmr.msra.gmra.mrb[4].mxu1 %vm553_vm2, %v1133_v34  ;;  %v636_v35 = vsel %vm553_vm2, %v1133_v34, 0.0 }
 0x26f   : > { %637 = vadd.xlane.f32.xlu0 %v636_v35 }
 0x2fc   : > { %v638_v37 = vpop.xlane.xlu0 %637 }
 0x2fd   : > { %1134 = vrcp.f32 %v638_v37 }
 0x307   : > { %v1135_v38 = vpop.eup %1134 }
 0x341   : > { %v708_v39 = vpop.f32.mrb[4].mxu1 }
 0x342   : > { %v713_v40 = vmul.f32 %v1135_v38, %v708_v39  ;;  %v1033_v41 = vpop.f32.mrb[5].mxu1 }
 0x344   : > { %1037 = vmatmul.mubr.msk.f32.vlgmr.msra.gmra.mrb[4].mxu0 %vm553_vm2, %v713_v40 }
 0x412   : > { %790 = sbr.rel (%p961_p0) target bundleno = 1049 (0x419), region = 44 }
 0x417   : > { %v783_v42 = vpop.f32.mrb[4].mxu0 }
 0x418   : > { %v1038_v43 = vpop.f32.mrb[5].mxu0 }
 0x419 PF: > { %v792_v45 = vld [vmem:[#allocation2] sm:$0xff]  ;;  %p962_p1 = scmp.ne.s32.totalorder %s1214_s21, 3 }
 0x41a   : > { %v793_v46 = vadd.f32 %v792_v45, %v783_v42 }
 0x41b   : > { %798 = sbr.rel (%p962_p1) target bundleno = 1061 (0x425), region = 48 }
 0x41c   : > { %794 = vst.msk [vmem:[#allocation2] sm:$0xff] %vm335_vm1, %v793_v46 }
 0x423   : > { %v799_v47 = vld [vmem:[#allocation2] sm:$0xff] }
 0x424   : > { %800 = vst.msk [vmem:[%s294_s16] sm:$0xff] %vm335_vm1, %v799_v47 }
 0x425 PF: > { %s964_s11 = sshll.u32 %s1218_s22, 7  ;;  %s816_s17 = sshll.u32 %s294_s16, 4  ;;  %s817_s17 = int_to_ptr.vmem [resolvable:$true] %s816_s17 }
 0x426   : > { %s1394_s13 = scalar_lea.hbm %s1448_s5, %s964_s11  ;;  %s802_s27 = scalar_lea.sflag [#allocation4], %s292_s10 }
 0x427   : > { %s1136_s14 = scalar_lea.vmem %s817_s17, 128  ;;  %s1236_s21 = smov [#allocation3]  }
 0x428   : > { %p1137_p2 = scmp.ne.s32.totalorder %s817_s17, %s1136_s14  ;;  %s1140_s7 = sshll.u32 %s1236_s21, 4  ;;  %s1141_s7 = int_to_ptr.vmem [resolvable:$false] %s1140_s7 }
 0x429   : > { %s1142_s8 = scalar_lea.vmem %s1141_s7, 256  ;;  %p1143_p6 = scmp.lt.s32.totalorder %s817_s17, %s1141_s7 }
 0x42a   : > { %p1138_p4 = pnand %p1137_p2, %p1316_p3  ;;  %p1144_p7 = scmp.lt.s32.totalorder %s1142_s8, %s1136_s14 }
 0x42c   : > { %p1139_p5 = pneg %p1138_p4  ;;  %p1145_p8 = por %p1144_p7, %p1143_p6 }
 0x42e   : > { %p1146_p10 = pnand %p1145_p8, %p1139_p5 }
 0x430   : > { %1149 = shalt.err (!%p1146_p10)
}
 0x431   : > { %s1150_s22 = scalar_lea.hbm %s1394_s13, 128  ;;  %s1154_s16 = scalar_lea.hbm %s1448_s5, 256 }
 0x432   : > { %p1151_p11 = scmp.ne.s32.totalorder %s1394_s13, %s1150_s22  ;;  %p1155_p0 = scmp.lt.u32.totalorder %s1394_s13, %s1448_s5 }
 0x433   : > { %p1156_p1 = scmp.lt.u32.totalorder %s1154_s16, %s1150_s22  ;;  %p1158_p4 = scmp.lt.u32.totalorder %s1150_s22, %s1394_s13 }
 0x434   : > { %p1152_p12 = pnand %p1151_p11, %p1316_p3 }
 0x435   : > { %p1157_p2 = por %p1156_p1, %p1155_p0 }
 0x436   : > { %p1153_p13 = pneg %p1152_p12 }
 0x437   : > { %p1159_p5 = por %p1158_p4, %p1157_p2 }
 0x439   : > { %p1160_p6 = pnand %p1159_p5, %p1153_p13 }
 0x43b   : > { %1163 = shalt.err (!%p1160_p6)
}
 0x43c   : > { %1057 = dma.vmem_to_hbm [thread:$0]  (%p1316_p3), %s817_s17, 128, %s1394_s13, %s802_s27  }
 0x43d PF: > { %p1063_p7 = scmp.ge.s32.totalorder %s1230_s25, 2  ;;  %s828_s26 = sand.u32 1, %s1202_s18  }
 0x43e   : > { %s829_s14 = scalar_lea.sflag [#allocation4], %s828_s26 }
 0x43f   : > { %p1060_p8 = pnand %p1063_p7, %p1326_p9 }
 0x441   : > { %1197 = dma.done.wait (!%p1060_p8), %s829_s14, 128  }
 0x442   : > { %1199 = vsyncadd (!%p1060_p8), %s829_s14, 4294967168  ;;  %s18_s25 = sadd.s32 1, %s1230_s25   ;;  %s1451_s18 = smov %s1206_s19 }
 0x443   : > { %p15_p10 = scmp.ge.s32.totalorder %s18_s25, 10   ;;  %s1452_s19 = smov %s1210_s20 }
 0x444   : > { %s1453_s20 = smov %s1334_s9  ;;  %s1454_s21 = smov %s1222_s23 }
 0x445   : > { %s1455_s22 = smov %s1226_s24  ;;  %s1456_s23 = smov %s1459_s28 }
 0x446   : > { %s1457_s24 = smov %s1463_s29  ;;  %17 = sbr.rel (!%p15_p10) target bundleno = 5 (0x5), region = 96 }
 0x44d   :  { %834 = vsyncpa [#allocation4], 1 }
 0x44e   :  { %836 = vsyncpa [#allocation4 + $0x1], 1 }

</bundles_post_ra>
